<compile_context>
chip_gen: v5e
topology: v5e:2x2
jax: 0.10.0
libtpu: 0.0.40
codegen_flags: <defaults>
</compile_context>

<pallas_src>
import jax
import jax.numpy as jnp
from jax.experimental import pallas as pl
from jax.experimental.pallas import tpu as pltpu


def _lp_kernel(x_ref, w_ref, b_ref, o_ref):
    # x_ref: (1, TN, C_in) f32 ; w_ref: (C_in, E) bf16 ; b_ref: (1, E) f32
    x = x_ref[0].astype(jnp.bfloat16)                   # bf16 operands -> MXU-native
    y = jnp.dot(x, w_ref[...], preferred_element_type=jnp.float32)   # f32 accumulate
    o_ref[0] = (y + b_ref[...]).astype(o_ref.dtype)


def _pick_tile_n(n, c_in, e, budget_bytes=24 << 20):
    """Largest token tile dividing N whose double-buffered working set fits budget."""
    for t in (1024, 512, 256, 128, 64, 32, 16, 8):
        if n % t:
            continue
        est = 2 * t * c_in * 4 + 2 * t * e * 4 + 2 * c_in * e * 2
        if est <= budget_bytes:
            return t
    return n


def lp_forward(x, weight, bias):
    """x: (B, C_in, H, W) f32; weight: (E, C_in); bias: (E,).  Returns (B, E, H, W)."""
    B, C_in, H, W = x.shape
    E = weight.shape[0]
    N = H * W

    # glue: NCHW -> (B, N, C_in)   (torch: x.flatten(2).transpose(1, 2))
    x_tokens = jnp.transpose(x.reshape(B, C_in, N), (0, 2, 1))

    # weight pre-transposed for row-vector matmul; bf16 halves weight HBM traffic.
    w_t = weight.T.astype(jnp.bfloat16)            # (C_in, E)
    b = bias.reshape(1, E).astype(jnp.float32)

    TN = _pick_tile_n(N, C_in, E)
    n_tiles = N // TN

    # Explicit VMEM budget: double-buffered x/out tiles + weight/bias, with headroom.
    est = 2 * TN * C_in * 4 + 2 * TN * E * 4 + 2 * C_in * E * 2 + 2 * 8 * E * 4
    vmem_limit = int(min(max(4 * est, 16 << 20), 48 << 20))

    y = pl.pallas_call(
        _lp_kernel,
        out_shape=jax.ShapeDtypeStruct((B, N, E), x.dtype),
        grid_spec=pltpu.PrefetchScalarGridSpec(
            num_scalar_prefetch=0,
            grid=(B, n_tiles),
            in_specs=[
                pl.BlockSpec((1, TN, C_in), lambda b_, n_: (b_, n_, 0)),   # tokens
                pl.BlockSpec((C_in, E), lambda b_, n_: (0, 0)),            # W^T (bf16)
                pl.BlockSpec((1, E), lambda b_, n_: (0, 0)),               # bias
            ],
            out_specs=pl.BlockSpec((1, TN, E), lambda b_, n_: (b_, n_, 0)),
        ),
        compiler_params=pltpu.CompilerParams(
            dimension_semantics=("parallel", "parallel"),
            vmem_limit_bytes=vmem_limit,
        ),
    )(x_tokens, w_t, b)

    # glue: (B, N, E) -> (B, H, W, E) -> (B, E, H, W)   (torch: reshape + permute)
    return jnp.transpose(y.reshape(B, H, W, E), (0, 3, 1, 2))


def lp_reference(x, weight, bias):
    """Pure-JAX reference mirroring the PyTorch LP.forward."""
    B, C_in, H, W = x.shape
    xt = jnp.transpose(x.reshape(B, C_in, H * W), (0, 2, 1))
    y = xt @ weight.T + bias
    return jnp.transpose(y.reshape(B, H, W, -1), (0, 3, 1, 2))


if __name__ == "__main__":
    # Small, lane-friendly shapes consistent with LP (input_dim -> embed_dim over H*W tokens).
    B, C_in, E, H, W = 2, 64, 128, 32, 32

    key = jax.random.PRNGKey(0)
    kx, kw, kb = jax.random.split(key, 3)
    x = jax.random.normal(kx, (B, C_in, H, W), jnp.float32)
    weight = jax.random.normal(kw, (E, C_in), jnp.float32) * 0.02
    bias = jax.random.normal(kb, (E,), jnp.float32) * 0.02

    out = lp_forward(x, weight, bias)
    out = jax.block_until_ready(out)

    ref = lp_reference(x, weight, bias)
    assert out.shape == (B, E, H, W)
    # bf16 MXU operands (f32 accumulation) -> loosened tolerance vs f32 reference.
    err = jnp.max(jnp.abs(out - ref))
    assert err < 1e-2, f"max abs err {err}"

    print("KERNEL_OK")
</pallas_src>

<mosaic_0001>
module attributes {stable_mosaic.version = 11 : i64} {
  func.func @_lp_kernel(%arg0: i32, %arg1: i32, %arg2: memref<1x1024x64xf32, #tpu.memory_space<vmem>>, %arg3: memref<64x128xbf16, #tpu.memory_space<vmem>>, %arg4: memref<1x128xf32, #tpu.memory_space<vmem>>, %arg5: memref<1x1024x128xf32, #tpu.memory_space<vmem>>) attributes {dimension_semantics = [#tpu.dimension_semantics<parallel>, #tpu.dimension_semantics<parallel>], iteration_bounds = array<i64: 2, 1>, scalar_prefetch = 0 : i64, scratch_operands = 0 : i64, tpu.core_type = #tpu.core_type<tc>, window_params = [{transform_indices = @transform_0, window_bounds = array<i64: 1, 1024, 64>}, {pipeline_mode = #tpu.pipeline_mode<synchronous>, transform_indices = @transform_1, window_bounds = array<i64: 64, 128>}, {pipeline_mode = #tpu.pipeline_mode<synchronous>, transform_indices = @transform_2, window_bounds = array<i64: 1, 128>}, {transform_indices = @transform_3, window_bounds = array<i64: 1, 1024, 128>}]} {
    %c0 = arith.constant 0 : index
    %c0_0 = arith.constant 0 : index
    %c0_1 = arith.constant 0 : index
    %0 = vector.load %arg2[%c0, %c0_0, %c0_1] : memref<1x1024x64xf32, #tpu.memory_space<vmem>>, vector<1x1024x64xf32>
    %1 = vector.shape_cast %0 : vector<1x1024x64xf32> to vector<1024x64xf32>
    %2 = arith.truncf %1 : vector<1024x64xf32> to vector<1024x64xbf16>
    %c0_2 = arith.constant 0 : index
    %c0_3 = arith.constant 0 : index
    %3 = vector.load %arg3[%c0_2, %c0_3] : memref<64x128xbf16, #tpu.memory_space<vmem>>, vector<64x128xbf16>
    %cst = arith.constant dense<0.000000e+00> : vector<1024x128xf32>
    %4 = tpu.matmul %2, %3, %cst {dimension_numbers = #tpu.dot_dimension_numbers<[1], [0], [0], [1], [0, 0, 1, 1], [], []>} : vector<1024x64xbf16>, vector<64x128xbf16>, vector<1024x128xf32> -> vector<1024x128xf32>
    %c0_4 = arith.constant 0 : index
    %c0_5 = arith.constant 0 : index
    %5 = vector.load %arg4[%c0_4, %c0_5] : memref<1x128xf32, #tpu.memory_space<vmem>>, vector<1x128xf32>
    %6 = vector.broadcast %5 : vector<1x128xf32> to vector<1024x128xf32>
    %7 = arith.addf %4, %6 : vector<1024x128xf32>
    %c0_6 = arith.constant 0 : index
    %c0_7 = arith.constant 0 : index
    %c0_8 = arith.constant 0 : index
    %8 = vector.load %arg5[%c0_6, %c0_7, %c0_8] : memref<1x1024x128xf32, #tpu.memory_space<vmem>>, vector<1x1024x128xf32>
    %9 = vector.shape_cast %8 : vector<1x1024x128xf32> to vector<1024x128xf32>
    %10 = vector.shape_cast %7 : vector<1024x128xf32> to vector<1x1024x128xf32>
    tpu.vector_store %arg5[%c0_6, %c0_7, %c0_8], %10 {strides = array<i32>} : memref<1x1024x128xf32, #tpu.memory_space<vmem>>, vector<1x1024x128xf32>,
    return
  }
  func.func @transform_0(%arg0: i32, %arg1: i32) -> (i32, i32, i32) {
    %c0_i32 = arith.constant 0 : i32
    %c0_i32_0 = arith.constant 0 : i32
    return %arg0, %arg1, %c0_i32 : i32, i32, i32
  }
  func.func @transform_1(%arg0: i32, %arg1: i32) -> (i32, i32) {
    %c0_i32 = arith.constant 0 : i32
    %c0_i32_0 = arith.constant 0 : i32
    %c0_i32_1 = arith.constant 0 : i32
    return %c0_i32, %c0_i32_0 : i32, i32
  }
  func.func @transform_2(%arg0: i32, %arg1: i32) -> (i32, i32) {
    %c0_i32 = arith.constant 0 : i32
    %c0_i32_0 = arith.constant 0 : i32
    %c0_i32_1 = arith.constant 0 : i32
    return %c0_i32, %c0_i32_0 : i32, i32
  }
  func.func @transform_3(%arg0: i32, %arg1: i32) -> (i32, i32, i32) {
    %c0_i32 = arith.constant 0 : i32
    %c0_i32_0 = arith.constant 0 : i32
    return %arg0, %arg1, %c0_i32 : i32, i32, i32
  }
}

</mosaic_0001>

<bundles_post_ra>
// kernel: tpu_custom_call.1
= control target key start
LH: loop header
LB: loop body
LE: loop exit
PB: predicated region body
PF: predicated region fallthrough
CT: control target
= control target key end

     0   :  { %8 = vsyncpa [#allocation3], 0  ;;  %s2020_s0 = inlined_call_operand.vmem [shape: f32[2,1024,64], index: 0, kind: input, shape index: {}]   ;;  %s2021_s1 = inlined_call_operand.vmem [shape: bf16[64,128], index: 1, kind: input, shape index: {}]   ;;  %s2022_s2 = inlined_call_operand.vmem [shape: f32[1,128], index: 2, kind: input, shape index: {}]   ;;  %s2023_s3 = inlined_call_operand.hbm [shape: f32[2,1024,128], index: 3, kind: output, shape index: {}]  }
   0x1   :  { %10 = vsyncpa [#allocation3 + $0x1], 0  ;;  %s1448_s12 = smov 0   ;;  %s1450_s13 = smov 0  }
   0x2   :  { %s1452_s14 = smov 0   ;;  %s1454_s15 = smov 0  }
   0x3   :  { %s1456_s16 = smov 0   ;;  %s1458_s17 = smov 0  }
   0x4 LB: > { %s1176_s18 = sadd.s32 4294967295, %s1424_s17   ;;  %s1177_s19 = sadd.s32 4294967294, %s1424_s17   ;;  %s1424_s17 = sphi %s1458_s17, %s16_s17   ;;  %s1420_s16 = sphi %s1456_s16, %s2030_s16   ;;  %s1416_s15 = sphi %s1454_s15, %s2029_s15   ;;  %s1412_s14 = sphi %s1452_s14, %s2028_s14   ;;  %s1408_s13 = sphi %s1450_s13, %s2027_s13   ;;  %s1404_s12 = sphi %s1448_s12, %s2026_s12  }
   0x5   : > { %s28_s20 = sadd.s32 1, %s1420_s16  ;;  %s107_s21 = sadd.s32 1, %s1412_s14 }
   0x6   : > { %p30_p0 = scmp.ge.s32.totalorder %s28_s20, 2  ;;  %p117_p1 = scmp.ne.s32.totalorder %s1412_s14, %s1408_s13 }
   0x7   : > { %p118_p2 = scmp.eq.s32.totalorder %s1176_s18, 1  ;;  %p123_p3 = scmp.ne.s32.totalorder %s1408_s13, %s1404_s12 }
   0x8   : > { %s2032_s20 = smov (%p30_p0, %s28_s20), 0  ;;  %p124_p5 = scmp.eq.s32.totalorder %s1177_s19, 1 }
   0x9   : > { %p1488_p4 = por %p118_p2, %p117_p1  ;;  %s102_s23 = ssub.s32 %s1420_s16, %s2032_s20 }
   0xa   : > { %p1180_p6 = scmp.ge.s32.totalorder %s1424_s17, 1  ;;  %p105_p7 = scmp.eq.s32.totalorder %s102_s23, 0 }
   0xb   : > { %p1495_p8 = por %p124_p5, %p123_p3  ;;  %p161_p9 = scmp.lt.s32.totalorder %s1424_s17, 3 }
   0xc   : > { %s1501_s25 = scalar_select %p105_p7, %s1412_s14, %s107_s21  }
   0xd   : > { %p162_p10 = pnand %p1180_p6, %p161_p9 }
   0xe   : > { %p190_p11 = scmp.lt.s32.totalorder (!%p162_p10), %s1416_s15, 1  ;;  %s186_s18 = sand.u32 (!%p162_p10), 1, %s1408_s13  }
   0xf   : > { %165 = sbr.rel (%p162_p10) target bundleno = 424 (0x1a8), region = 32  ;;  %s1181_s23 = sshll.u32 (!%p162_p10), %s186_s18, 10 }
  0x10   : > { %s1636_s26 = scalar_lea.vmem (!%p162_p10), [#allocation2], %s1181_s23  ;;  %s1274_s27 = sshll.u32 (!%p162_p10), %s1416_s15, 10 }
  0x11   : > { %s1080_s7 = scalar_lea.sflag (!%p162_p10), [#allocation3], %s186_s18  ;;  %s1366_s19 = scalar_lea.hbm (!%p162_p10), %s2023_s3, 2048 }
  0x14   : > { %v1273_v0 = vld [vmem:[%s2021_s1 + $0x18] sm:$0xff]  ;;  %v1272_v1 = vld [vmem:[%s2021_s1 + $0x10] sm:$0xff]  ;;  %s191_s30 = scalar_select %p190_p11, %s1416_s15, 1  ;;  %v1271_v2 = vld [vmem:[%s2021_s1 + $0x8] sm:$0xff]  ;;  %vm429_vm0 = vcmask 523264  }
  0x15   : > { %626 = vmatpush.bf16.msra.mxu0 %v1273_v0  ;;  %1275 = vmatpush.bf16.msra.mxu1 %v1273_v0  ;;  %v1270_v3 = vld [vmem:[%s2021_s1] sm:$0xff]  ;;  %s1094_s15 = sshll.u32 %s1636_s26, 4  ;;  %s1095_s15 = int_to_ptr.vmem [resolvable:$true] %s1094_s15 }
  0x16   : > { %1276 = vmatpush.bf16.msra.mxu2 %v1273_v0  ;;  %1277 = vmatpush.bf16.msra.mxu3 %v1273_v0  ;;  %s1269_s4 = sshll.u32 %s191_s30, 10  ;;  %s1093_s30 = scalar_lea.hbm %s2023_s3, %s1274_s27 }
  0x17   : > { %s1517_s9 = scalar_lea.vmem %s2020_s0, %s1269_s4  ;;  %s1096_s4 = sshll.u32 %s1093_s30, 4  ;;  %s1097_s4 = int_to_ptr.hbm [resolvable:$true] %s1096_s4 }
  0x18   : > { %v201_v4 = vld [vmem:[%s1517_s9] sm:$0xff]  ;;  %v202_v5 = vld [vmem:[%s1517_s9 + $0x8] sm:$0xff]  ;;  %v203_v16 = vld [vmem:[%s1517_s9 + $0x10] sm:$0xff]  ;;  %s1360_s8 = sshra.s32 %s1097_s4, 4  ;;  %s1361_s8 = int_to_ptr.hbm [resolvable:$true] %s1360_s8 }
  0x19   : > { %627 = vmatpush.bf16.msra.mxu0 %v1272_v1  ;;  %1278 = vmatpush.bf16.msra.mxu1 %v1272_v1  ;;  %v233_v6 = vld [vmem:[%s1517_s9 + $0x100] sm:$0xff]  ;;  %v234_v7 = vld [vmem:[%s1517_s9 + $0x108] sm:$0xff]  ;;  %v329_v12 = vpack.c.bf16 %v202_v5, %v201_v4  ;;  %v204_v17 = vld [vmem:[%s1517_s9 + $0x18] sm:$0xff]  ;;  %p1367_p1 = scmp.lt.s32.totalorder %s1361_s8, %s2023_s3 }
  0x1a   : > { %1279 = vmatpush.bf16.msra.mxu2 %v1272_v1  ;;  %1280 = vmatpush.bf16.msra.mxu3 %v1272_v1  ;;  %v265_v8 = vld [vmem:[%s1517_s9 + $0x200] sm:$0xff]  ;;  %v266_v9 = vld [vmem:[%s1517_s9 + $0x208] sm:$0xff]  ;;  %v345_v13 = vpack.c.bf16 %v234_v7, %v233_v6  ;;  %v235_v18 = vld [vmem:[%s1517_s9 + $0x110] sm:$0xff]  ;;  %v330_v24 = vpack.c.bf16 %v204_v17, %v203_v16 }
  0x1b   : > { %v297_v10 = vld [vmem:[%s1517_s9 + $0x300] sm:$0xff]  ;;  %v298_v11 = vld [vmem:[%s1517_s9 + $0x308] sm:$0xff]  ;;  %v361_v14 = vpack.c.bf16 %v266_v9, %v265_v8  ;;  %v236_v19 = vld [vmem:[%s1517_s9 + $0x118] sm:$0xff] }
  0x1c   : > { %v377_v15 = vpack.c.bf16 %v298_v11, %v297_v10  ;;  %v267_v20 = vld [vmem:[%s1517_s9 + $0x210] sm:$0xff]  ;;  %v268_v21 = vld [vmem:[%s1517_s9 + $0x218] sm:$0xff]  ;;  %v346_v25 = vpack.c.bf16 %v236_v19, %v235_v18  ;;  %v205_v28 = vld [vmem:[%s1517_s9 + $0x20] sm:$0xff] }
  0x1d   : > { %628 = vmatpush.bf16.msra.mxu0 %v1271_v2  ;;  %1281 = vmatpush.bf16.msra.mxu1 %v1271_v2  ;;  %v299_v22 = vld [vmem:[%s1517_s9 + $0x310] sm:$0xff]  ;;  %v300_v23 = vld [vmem:[%s1517_s9 + $0x318] sm:$0xff]  ;;  %v362_v26 = vpack.c.bf16 %v268_v21, %v267_v20  ;;  %v206_v29 = vld [vmem:[%s1517_s9 + $0x28] sm:$0xff] }
  0x1e   : > { %1282 = vmatpush.bf16.msra.mxu2 %v1271_v2  ;;  %1283 = vmatpush.bf16.msra.mxu3 %v1271_v2  ;;  %v378_v27 = vpack.c.bf16 %v300_v23, %v299_v22  ;;  %v237_v30 = vld [vmem:[%s1517_s9 + $0x120] sm:$0xff]  ;;  %v238_v31 = vld [vmem:[%s1517_s9 + $0x128] sm:$0xff]  ;;  %v331_v36 = vpack.c.bf16 %v206_v29, %v205_v28  ;;  %v207_v40 = vld [vmem:[%s1517_s9 + $0x30] sm:$0xff] }
  0x1f   : > { %v269_v32 = vld [vmem:[%s1517_s9 + $0x220] sm:$0xff]  ;;  %v270_v33 = vld [vmem:[%s1517_s9 + $0x228] sm:$0xff]  ;;  %v347_v37 = vpack.c.bf16 %v238_v31, %v237_v30  ;;  %v208_v41 = vld [vmem:[%s1517_s9 + $0x38] sm:$0xff] }
  0x20   : > { %v301_v34 = vld [vmem:[%s1517_s9 + $0x320] sm:$0xff]  ;;  %v302_v35 = vld [vmem:[%s1517_s9 + $0x328] sm:$0xff]  ;;  %v363_v38 = vpack.c.bf16 %v270_v33, %v269_v32  ;;  %v239_v42 = vld [vmem:[%s1517_s9 + $0x130] sm:$0xff]  ;;  %v332_v48 = vpack.c.bf16 %v208_v41, %v207_v40 }
  0x21   : > { %629 = vmatpush.bf16.msra.mxu0 %v1270_v3  ;;  %1284 = vmatpush.bf16.msra.mxu1 %v1270_v3  ;;  %v379_v39 = vpack.c.bf16 %v302_v35, %v301_v34  ;;  %v240_v43 = vld [vmem:[%s1517_s9 + $0x138] sm:$0xff]  ;;  %v271_v44 = vld [vmem:[%s1517_s9 + $0x230] sm:$0xff]  ;;  %v209_v52 = vld [vmem:[%s1517_s9 + $0x40] sm:$0xff] }
  0x22   : > { %1285 = vmatpush.bf16.msra.mxu2 %v1270_v3  ;;  %1286 = vmatpush.bf16.msra.mxu3 %v1270_v3  ;;  %v272_v45 = vld [vmem:[%s1517_s9 + $0x238] sm:$0xff]  ;;  %v303_v46 = vld [vmem:[%s1517_s9 + $0x330] sm:$0xff]  ;;  %v348_v49 = vpack.c.bf16 %v240_v43, %v239_v42  ;;  %v210_v53 = vld [vmem:[%s1517_s9 + $0x48] sm:$0xff] }
  0x23   : > { %v304_v47 = vld [vmem:[%s1517_s9 + $0x338] sm:$0xff]  ;;  %v364_v50 = vpack.c.bf16 %v272_v45, %v271_v44  ;;  %v241_v54 = vld [vmem:[%s1517_s9 + $0x140] sm:$0xff]  ;;  %v242_v55 = vld [vmem:[%s1517_s9 + $0x148] sm:$0xff]  ;;  %v333_v60 = vpack.c.bf16 %v210_v53, %v209_v52 }
  0x24   : > { %1200 = vmatmul.msk.bf16.vlgmr.msra.gmra.mxu0 %vm429_vm0, %v329_v12  ;;  %1216 = vmatmul.msk.bf16.vlgmr.msra.gmra.mxu1 %vm429_vm0, %v345_v13  ;;  %v380_v51 = vpack.c.bf16 %v304_v47, %v303_v46  ;;  %v273_v56 = vld [vmem:[%s1517_s9 + $0x240] sm:$0xff]  ;;  %v274_v57 = vld [vmem:[%s1517_s9 + $0x248] sm:$0xff]  ;;  %v349_v61 = vpack.c.bf16 %v242_v55, %v241_v54  ;;  %v211_v0 = vld [vmem:[%s1517_s9 + $0x50] sm:$0xff] }
  0x25   : > { %1232 = vmatmul.msk.bf16.vlgmr.msra.gmra.mxu2 %vm429_vm0, %v361_v14  ;;  %1248 = vmatmul.msk.bf16.vlgmr.msra.gmra.mxu3 %vm429_vm0, %v377_v15  ;;  %v305_v58 = vld [vmem:[%s1517_s9 + $0x340] sm:$0xff]  ;;  %v306_v59 = vld [vmem:[%s1517_s9 + $0x348] sm:$0xff]  ;;  %v365_v62 = vpack.c.bf16 %v274_v57, %v273_v56  ;;  %v212_v1 = vld [vmem:[%s1517_s9 + $0x58] sm:$0xff] }
  0x26   : > { %v381_v63 = vpack.c.bf16 %v306_v59, %v305_v58  ;;  %v243_v2 = vld [vmem:[%s1517_s9 + $0x150] sm:$0xff]  ;;  %v244_v3 = vld [vmem:[%s1517_s9 + $0x158] sm:$0xff]  ;;  %v334_v8 = vpack.c.bf16 %v212_v1, %v211_v0  ;;  %v213_v12 = vld [vmem:[%s1517_s9 + $0x60] sm:$0xff] }
  0x27   : > { %v275_v4 = vld [vmem:[%s1517_s9 + $0x250] sm:$0xff]  ;;  %v276_v5 = vld [vmem:[%s1517_s9 + $0x258] sm:$0xff]  ;;  %v350_v9 = vpack.c.bf16 %v244_v3, %v243_v2  ;;  %v214_v13 = vld [vmem:[%s1517_s9 + $0x68] sm:$0xff] }
  0x28   : > { %v307_v6 = vld [vmem:[%s1517_s9 + $0x350] sm:$0xff]  ;;  %v308_v7 = vld [vmem:[%s1517_s9 + $0x358] sm:$0xff]  ;;  %v366_v10 = vpack.c.bf16 %v276_v5, %v275_v4  ;;  %v245_v14 = vld [vmem:[%s1517_s9 + $0x160] sm:$0xff]  ;;  %v335_v20 = vpack.c.bf16 %v214_v13, %v213_v12 }
  0x29   : > { %v382_v11 = vpack.c.bf16 %v308_v7, %v307_v6  ;;  %v246_v15 = vld [vmem:[%s1517_s9 + $0x168] sm:$0xff]  ;;  %v277_v16 = vld [vmem:[%s1517_s9 + $0x260] sm:$0xff]  ;;  %v279_v28 = vld [vmem:[%s1517_s9 + $0x270] sm:$0xff] }
  0x2a   : > { %v278_v17 = vld [vmem:[%s1517_s9 + $0x268] sm:$0xff]  ;;  %v309_v18 = vld [vmem:[%s1517_s9 + $0x360] sm:$0xff]  ;;  %v351_v21 = vpack.c.bf16 %v246_v15, %v245_v14  ;;  %v280_v29 = vld [vmem:[%s1517_s9 + $0x278] sm:$0xff] }
  0x2b   : > { %v310_v19 = vld [vmem:[%s1517_s9 + $0x368] sm:$0xff]  ;;  %v367_v22 = vpack.c.bf16 %v278_v17, %v277_v16  ;;  %v311_v30 = vld [vmem:[%s1517_s9 + $0x370] sm:$0xff]  ;;  %v312_v31 = vld [vmem:[%s1517_s9 + $0x378] sm:$0xff]  ;;  %v368_v34 = vpack.c.bf16 %v280_v29, %v279_v28 }
  0x2c   : > { %v383_v23 = vpack.c.bf16 %v310_v19, %v309_v18  ;;  %v384_v35 = vpack.c.bf16 %v312_v31, %v311_v30  ;;  %v250_v40 = vld [vmem:[%s1517_s9 + $0x188] sm:$0xff]  ;;  %v281_v41 = vld [vmem:[%s1517_s9 + $0x280] sm:$0xff]  ;;  %v252_v0 = vld [vmem:[%s1517_s9 + $0x198] sm:$0xff] }
  0x2d   : > { %v282_v42 = vld [vmem:[%s1517_s9 + $0x288] sm:$0xff]  ;;  %v313_v43 = vld [vmem:[%s1517_s9 + $0x380] sm:$0xff]  ;;  %v283_v1 = vld [vmem:[%s1517_s9 + $0x290] sm:$0xff] }
  0x2e   : > { %v314_v44 = vld [vmem:[%s1517_s9 + $0x388] sm:$0xff]  ;;  %v284_v2 = vld [vmem:[%s1517_s9 + $0x298] sm:$0xff]  ;;  %v315_v3 = vld [vmem:[%s1517_s9 + $0x390] sm:$0xff] }
  0x2f   : > { %v316_v4 = vld [vmem:[%s1517_s9 + $0x398] sm:$0xff]  ;;  %v370_v13 = vpack.c.bf16 %v284_v2, %v283_v1  ;;  %v254_v28 = vld [vmem:[%s1517_s9 + $0x1a8] sm:$0xff]  ;;  %v285_v29 = vld [vmem:[%s1517_s9 + $0x2a0] sm:$0xff] }
  0x30   : > { %v386_v14 = vpack.c.bf16 %v316_v4, %v315_v3  ;;  %v286_v30 = vld [vmem:[%s1517_s9 + $0x2a8] sm:$0xff]  ;;  %v317_v31 = vld [vmem:[%s1517_s9 + $0x3a0] sm:$0xff] }
  0x34   : > { %1201 = vmatmul.msk.bf16.gmra.mxu0 %vm429_vm0, %v330_v24  ;;  %1217 = vmatmul.msk.bf16.gmra.mxu1 %vm429_vm0, %v346_v25  ;;  %v215_v24 = vld [vmem:[%s1517_s9 + $0x70] sm:$0xff]  ;;  %v216_v25 = vld [vmem:[%s1517_s9 + $0x78] sm:$0xff] }
  0x35   : > { %1233 = vmatmul.msk.bf16.gmra.mxu2 %vm429_vm0, %v362_v26  ;;  %1249 = vmatmul.msk.bf16.gmra.mxu3 %vm429_vm0, %v378_v27  ;;  %v247_v26 = vld [vmem:[%s1517_s9 + $0x170] sm:$0xff]  ;;  %v248_v27 = vld [vmem:[%s1517_s9 + $0x178] sm:$0xff]  ;;  %v336_v32 = vpack.c.bf16 %v216_v25, %v215_v24  ;;  %v221_v25 = vld [vmem:[%s1517_s9 + $0xa0] sm:$0xff] }
  0x36   : > { %v352_v33 = vpack.c.bf16 %v248_v27, %v247_v26  ;;  %v222_v26 = vld [vmem:[%s1517_s9 + $0xa8] sm:$0xff]  ;;  %v253_v27 = vld [vmem:[%s1517_s9 + $0x1a0] sm:$0xff] }
  0x44   : > { %1202 = vmatmul.msk.bf16.gmra.mxu0 %vm429_vm0, %v331_v36  ;;  %1218 = vmatmul.msk.bf16.gmra.mxu1 %vm429_vm0, %v347_v37  ;;  %v1622_v36 = vld [vmem:[%s2022_s2] ss:$0 sm:$0xff] }
  0x45   : > { %1234 = vmatmul.msk.bf16.gmra.mxu2 %vm429_vm0, %v363_v38  ;;  %1250 = vmatmul.msk.bf16.gmra.mxu3 %vm429_vm0, %v379_v39  ;;  %v217_v37 = vld [vmem:[%s1517_s9 + $0x80] sm:$0xff]  ;;  %v218_v38 = vld [vmem:[%s1517_s9 + $0x88] sm:$0xff] }
  0x46   : > { %v249_v39 = vld [vmem:[%s1517_s9 + $0x180] sm:$0xff]  ;;  %v337_v45 = vpack.c.bf16 %v218_v38, %v217_v37  ;;  %v355_v37 = vpack.c.bf16 %v254_v28, %v253_v27 }
  0x47   : > { %v353_v46 = vpack.c.bf16 %v250_v40, %v249_v39 }
  0x54   : > { %1203 = vmatmul.msk.bf16.gmra.mxu0 %vm429_vm0, %v332_v48  ;;  %1219 = vmatmul.msk.bf16.gmra.mxu1 %vm429_vm0, %v348_v49  ;;  %v369_v49 = vpack.c.bf16 %v282_v42, %v281_v41  ;;  %v371_v42 = vpack.c.bf16 %v286_v30, %v285_v29 }
  0x55   : > { %1235 = vmatmul.msk.bf16.gmra.mxu2 %vm429_vm0, %v364_v50  ;;  %1251 = vmatmul.msk.bf16.gmra.mxu3 %vm429_vm0, %v380_v51  ;;  %v385_v50 = vpack.c.bf16 %v314_v44, %v313_v43 }
  0x64   : > { %1204 = vmatmul.msk.bf16.gmra.mxu0 %vm429_vm0, %v333_v60  ;;  %1220 = vmatmul.msk.bf16.gmra.mxu1 %vm429_vm0, %v349_v61  ;;  %v219_v61 = vld [vmem:[%s1517_s9 + $0x90] sm:$0xff] }
  0x65   : > { %1236 = vmatmul.msk.bf16.gmra.mxu2 %vm429_vm0, %v365_v62  ;;  %1252 = vmatmul.msk.bf16.gmra.mxu3 %vm429_vm0, %v381_v63  ;;  %v220_v62 = vld [vmem:[%s1517_s9 + $0x98] sm:$0xff]  ;;  %v251_v63 = vld [vmem:[%s1517_s9 + $0x190] sm:$0xff] }
  0x66   : > { %v338_v7 = vpack.c.bf16 %v220_v62, %v219_v61  ;;  %v320_v61 = vld [vmem:[%s1517_s9 + $0x3b8] sm:$0xff] }
  0x74   : > { %1205 = vmatmul.msk.bf16.gmra.mxu0 %vm429_vm0, %v334_v8  ;;  %1221 = vmatmul.msk.bf16.gmra.mxu1 %vm429_vm0, %v350_v9  ;;  %v354_v8 = vpack.c.bf16 %v252_v0, %v251_v63 }
  0x75   : > { %1237 = vmatmul.msk.bf16.gmra.mxu2 %vm429_vm0, %v366_v10  ;;  %1253 = vmatmul.msk.bf16.gmra.mxu3 %vm429_vm0, %v382_v11 }
  0x84   : > { %1206 = vmatmul.msk.bf16.gmra.mxu0 %vm429_vm0, %v335_v20  ;;  %1222 = vmatmul.msk.bf16.gmra.mxu1 %vm429_vm0, %v351_v21 }
  0x85   : > { %1238 = vmatmul.msk.bf16.gmra.mxu2 %vm429_vm0, %v367_v22  ;;  %1254 = vmatmul.msk.bf16.gmra.mxu3 %vm429_vm0, %v383_v23 }
  0x94   : > { %1207 = vmatmul.msk.bf16.gmra.mxu0 %vm429_vm0, %v336_v32  ;;  %1223 = vmatmul.msk.bf16.gmra.mxu1 %vm429_vm0, %v352_v33  ;;  %v318_v32 = vld [vmem:[%s1517_s9 + $0x3a8] sm:$0xff] }
  0x95   : > { %1239 = vmatmul.msk.bf16.gmra.mxu2 %vm429_vm0, %v368_v34  ;;  %1255 = vmatmul.msk.bf16.gmra.mxu3 %vm429_vm0, %v384_v35  ;;  %v339_v35 = vpack.c.bf16 %v222_v26, %v221_v25  ;;  %v387_v43 = vpack.c.bf16 %v318_v32, %v317_v31  ;;  %v322_v25 = vld [vmem:[%s1517_s9 + $0x3c8] sm:$0xff] }
  0xa1   : > { %v631_v47 = vpop.f32.mrf.mxu0  ;;  %v711_v48 = vpop.f32.mrf.mxu1 }
  0xa2   : > { %v632_v51 = vadd.f32 %v1622_v36, %v631_v47  ;;  %v712_v52 = vadd.f32 %v1622_v36, %v711_v48 }
  0xa4   : > { %951 = vst [vmem:[%s1636_s26] sm:$0xff] %v632_v51  ;;  %1208 = vmatmul.msk.bf16.gmra.mxu0 %vm429_vm0, %v337_v45  ;;  %1224 = vmatmul.msk.bf16.gmra.mxu1 %vm429_vm0, %v353_v46 }
  0xa5   : > { %983 = vst [vmem:[%s1636_s26 + $0x100] sm:$0xff] %v712_v52  ;;  %1240 = vmatmul.msk.bf16.gmra.mxu2 %vm429_vm0, %v369_v49  ;;  %1256 = vmatmul.msk.bf16.gmra.mxu3 %vm429_vm0, %v385_v50 }
  0xa8   : > { %v791_v53 = vpop.f32.mrf.mxu2  ;;  %v871_v54 = vpop.f32.mrf.mxu3 }
  0xa9   : > { %v792_v55 = vadd.f32 %v1622_v36, %v791_v53  ;;  %v872_v56 = vadd.f32 %v1622_v36, %v871_v54  ;;  %v633_v57 = vpop.f32.mrf.mxu0  ;;  %v713_v58 = vpop.f32.mrf.mxu1  ;;  %v223_v54 = vld [vmem:[%s1517_s9 + $0xb0] sm:$0xff] }
  0xaa   : > { %v634_v59 = vadd.f32 %v1622_v36, %v633_v57  ;;  %v714_v60 = vadd.f32 %v1622_v36, %v713_v58  ;;  %v256_v57 = vld [vmem:[%s1517_s9 + $0x1b8] sm:$0xff]  ;;  %v287_v58 = vld [vmem:[%s1517_s9 + $0x2b0] sm:$0xff] }
  0xab   : > { %1015 = vst [vmem:[%s1636_s26 + $0x200] sm:$0xff] %v792_v55  ;;  %v224_v55 = vld [vmem:[%s1517_s9 + $0xb8] sm:$0xff] }
  0xac   : > { %1047 = vst [vmem:[%s1636_s26 + $0x300] sm:$0xff] %v872_v56  ;;  %v255_v56 = vld [vmem:[%s1517_s9 + $0x1b0] sm:$0xff]  ;;  %v340_v0 = vpack.c.bf16 %v224_v55, %v223_v54  ;;  %v324_v54 = vld [vmem:[%s1517_s9 + $0x3d8] sm:$0xff] }
  0xad   : > { %952 = vst [vmem:[%s1636_s26 + $0x8] sm:$0xff] %v634_v59  ;;  %v288_v59 = vld [vmem:[%s1517_s9 + $0x2b8] sm:$0xff]  ;;  %v356_v1 = vpack.c.bf16 %v256_v57, %v255_v56 }
  0xae   : > { %984 = vst [vmem:[%s1636_s26 + $0x108] sm:$0xff] %v714_v60  ;;  %v319_v60 = vld [vmem:[%s1517_s9 + $0x3b0] sm:$0xff] }
  0xb0   : > { %v793_v5 = vpop.f32.mrf.mxu2  ;;  %v873_v6 = vpop.f32.mrf.mxu3 }
  0xb1   : > { %v794_v9 = vadd.f32 %v1622_v36, %v793_v5  ;;  %v874_v10 = vadd.f32 %v1622_v36, %v873_v6  ;;  %v636_v11 = vpop.f32.mrf.mxu0  ;;  %v716_v12 = vpop.f32.mrf.mxu1  ;;  %v372_v6 = vpack.c.bf16 %v288_v59, %v287_v58 }
  0xb2   : > { %v637_v15 = vadd.f32 %v1622_v36, %v636_v11  ;;  %v717_v16 = vadd.f32 %v1622_v36, %v716_v12 }
  0xb3   : > { %1016 = vst [vmem:[%s1636_s26 + $0x208] sm:$0xff] %v794_v9 }
  0xb4   : > { %1048 = vst [vmem:[%s1636_s26 + $0x308] sm:$0xff] %v874_v10  ;;  %1209 = vmatmul.msk.bf16.gmra.mxu0 %vm429_vm0, %v338_v7  ;;  %1225 = vmatmul.msk.bf16.gmra.mxu1 %vm429_vm0, %v354_v8  ;;  %v388_v7 = vpack.c.bf16 %v320_v61, %v319_v60 }
  0xb5   : > { %953 = vst [vmem:[%s1636_s26 + $0x10] sm:$0xff] %v637_v15  ;;  %1241 = vmatmul.msk.bf16.gmra.mxu2 %vm429_vm0, %v370_v13  ;;  %1257 = vmatmul.msk.bf16.gmra.mxu3 %vm429_vm0, %v386_v14 }
  0xb6   : > { %985 = vst [vmem:[%s1636_s26 + $0x110] sm:$0xff] %v717_v16 }
  0xb8   : > { %v796_v17 = vpop.f32.mrf.mxu2  ;;  %v876_v18 = vpop.f32.mrf.mxu3 }
  0xb9   : > { %v797_v19 = vadd.f32 %v1622_v36, %v796_v17  ;;  %v877_v20 = vadd.f32 %v1622_v36, %v876_v18  ;;  %v638_v21 = vpop.f32.mrf.mxu0  ;;  %v718_v22 = vpop.f32.mrf.mxu1  ;;  %v225_v18 = vld [vmem:[%s1517_s9 + $0xc0] sm:$0xff] }
  0xba   : > { %v639_v23 = vadd.f32 %v1622_v36, %v638_v21  ;;  %v719_v24 = vadd.f32 %v1622_v36, %v718_v22  ;;  %v258_v21 = vld [vmem:[%s1517_s9 + $0x1c8] sm:$0xff]  ;;  %v289_v22 = vld [vmem:[%s1517_s9 + $0x2c0] sm:$0xff] }
  0xbb   : > { %1017 = vst [vmem:[%s1636_s26 + $0x210] sm:$0xff] %v797_v19  ;;  %v226_v19 = vld [vmem:[%s1517_s9 + $0xc8] sm:$0xff] }
  0xbc   : > { %1049 = vst [vmem:[%s1636_s26 + $0x310] sm:$0xff] %v877_v20  ;;  %v257_v20 = vld [vmem:[%s1517_s9 + $0x1c0] sm:$0xff]  ;;  %v341_v28 = vpack.c.bf16 %v226_v19, %v225_v18  ;;  %v326_v18 = vld [vmem:[%s1517_s9 + $0x3e8] sm:$0xff] }
  0xbd   : > { %954 = vst [vmem:[%s1636_s26 + $0x18] sm:$0xff] %v639_v23  ;;  %v290_v23 = vld [vmem:[%s1517_s9 + $0x2c8] sm:$0xff]  ;;  %v357_v29 = vpack.c.bf16 %v258_v21, %v257_v20 }
  0xbe   : > { %986 = vst [vmem:[%s1636_s26 + $0x118] sm:$0xff] %v719_v24  ;;  %v321_v24 = vld [vmem:[%s1517_s9 + $0x3c0] sm:$0xff] }
  0xc0   : > { %v798_v33 = vpop.f32.mrf.mxu2  ;;  %v878_v34 = vpop.f32.mrf.mxu3 }
  0xc1   : > { %v799_v38 = vadd.f32 %v1622_v36, %v798_v33  ;;  %v879_v39 = vadd.f32 %v1622_v36, %v878_v34  ;;  %v641_v40 = vpop.f32.mrf.mxu0  ;;  %v721_v41 = vpop.f32.mrf.mxu1  ;;  %v373_v34 = vpack.c.bf16 %v290_v23, %v289_v22 }
  0xc2   : > { %v642_v44 = vadd.f32 %v1622_v36, %v641_v40  ;;  %v722_v45 = vadd.f32 %v1622_v36, %v721_v41 }
  0xc3   : > { %1018 = vst [vmem:[%s1636_s26 + $0x218] sm:$0xff] %v799_v38 }
  0xc4   : > { %1050 = vst [vmem:[%s1636_s26 + $0x318] sm:$0xff] %v879_v39  ;;  %1210 = vmatmul.msk.bf16.gmra.mxu0 %vm429_vm0, %v339_v35  ;;  %1226 = vmatmul.msk.bf16.gmra.mxu1 %vm429_vm0, %v355_v37  ;;  %v389_v35 = vpack.c.bf16 %v322_v25, %v321_v24 }
  0xc5   : > { %955 = vst [vmem:[%s1636_s26 + $0x20] sm:$0xff] %v642_v44  ;;  %1242 = vmatmul.msk.bf16.gmra.mxu2 %vm429_vm0, %v371_v42  ;;  %1258 = vmatmul.msk.bf16.gmra.mxu3 %vm429_vm0, %v387_v43 }
  0xc6   : > { %987 = vst [vmem:[%s1636_s26 + $0x120] sm:$0xff] %v722_v45 }
  0xc8   : > { %v801_v46 = vpop.f32.mrf.mxu2  ;;  %v881_v47 = vpop.f32.mrf.mxu3 }
  0xc9   : > { %v802_v48 = vadd.f32 %v1622_v36, %v801_v46  ;;  %v882_v49 = vadd.f32 %v1622_v36, %v881_v47  ;;  %v643_v50 = vpop.f32.mrf.mxu0  ;;  %v723_v51 = vpop.f32.mrf.mxu1  ;;  %v227_v47 = vld [vmem:[%s1517_s9 + $0xd0] sm:$0xff] }
  0xca   : > { %v644_v52 = vadd.f32 %v1622_v36, %v643_v50  ;;  %v724_v53 = vadd.f32 %v1622_v36, %v723_v51  ;;  %v260_v50 = vld [vmem:[%s1517_s9 + $0x1d8] sm:$0xff]  ;;  %v291_v51 = vld [vmem:[%s1517_s9 + $0x2d0] sm:$0xff] }
  0xcb   : > { %1019 = vst [vmem:[%s1636_s26 + $0x220] sm:$0xff] %v802_v48  ;;  %v228_v48 = vld [vmem:[%s1517_s9 + $0xd8] sm:$0xff] }
  0xcc   : > { %1051 = vst [vmem:[%s1636_s26 + $0x320] sm:$0xff] %v882_v49  ;;  %v259_v49 = vld [vmem:[%s1517_s9 + $0x1d0] sm:$0xff]  ;;  %v342_v57 = vpack.c.bf16 %v228_v48, %v227_v47  ;;  %v328_v47 = vld [vmem:[%s1517_s9 + $0x3f8] sm:$0xff] }
  0xcd   : > { %956 = vst [vmem:[%s1636_s26 + $0x28] sm:$0xff] %v644_v52  ;;  %v292_v52 = vld [vmem:[%s1517_s9 + $0x2d8] sm:$0xff]  ;;  %v358_v58 = vpack.c.bf16 %v260_v50, %v259_v49 }
  0xce   : > { %988 = vst [vmem:[%s1636_s26 + $0x128] sm:$0xff] %v724_v53  ;;  %v323_v53 = vld [vmem:[%s1517_s9 + $0x3d0] sm:$0xff] }
  0xd0   : > { %v803_v62 = vpop.f32.mrf.mxu2  ;;  %v883_v63 = vpop.f32.mrf.mxu3 }
  0xd1   : > { %v804_v2 = vadd.f32 %v1622_v36, %v803_v62  ;;  %v884_v3 = vadd.f32 %v1622_v36, %v883_v63  ;;  %v646_v4 = vpop.f32.mrf.mxu0  ;;  %v726_v5 = vpop.f32.mrf.mxu1  ;;  %v374_v63 = vpack.c.bf16 %v292_v52, %v291_v51 }
  0xd2   : > { %v647_v8 = vadd.f32 %v1622_v36, %v646_v4  ;;  %v727_v9 = vadd.f32 %v1622_v36, %v726_v5 }
  0xd3   : > { %1020 = vst [vmem:[%s1636_s26 + $0x228] sm:$0xff] %v804_v2 }
  0xd4   : > { %1052 = vst [vmem:[%s1636_s26 + $0x328] sm:$0xff] %v884_v3  ;;  %1211 = vmatmul.msk.bf16.gmra.mxu0 %vm429_vm0, %v340_v0  ;;  %1227 = vmatmul.msk.bf16.gmra.mxu1 %vm429_vm0, %v356_v1  ;;  %v390_v0 = vpack.c.bf16 %v324_v54, %v323_v53 }
  0xd5   : > { %957 = vst [vmem:[%s1636_s26 + $0x30] sm:$0xff] %v647_v8  ;;  %1243 = vmatmul.msk.bf16.gmra.mxu2 %vm429_vm0, %v372_v6  ;;  %1259 = vmatmul.msk.bf16.gmra.mxu3 %vm429_vm0, %v388_v7 }
  0xd6   : > { %989 = vst [vmem:[%s1636_s26 + $0x130] sm:$0xff] %v727_v9 }
  0xd8   : > { %v806_v10 = vpop.f32.mrf.mxu2  ;;  %v886_v11 = vpop.f32.mrf.mxu3 }
  0xd9   : > { %v807_v12 = vadd.f32 %v1622_v36, %v806_v10  ;;  %v887_v13 = vadd.f32 %v1622_v36, %v886_v11  ;;  %v648_v14 = vpop.f32.mrf.mxu0  ;;  %v728_v15 = vpop.f32.mrf.mxu1  ;;  %v229_v11 = vld [vmem:[%s1517_s9 + $0xe0] sm:$0xff] }
  0xda   : > { %v649_v16 = vadd.f32 %v1622_v36, %v648_v14  ;;  %v729_v17 = vadd.f32 %v1622_v36, %v728_v15  ;;  %v262_v14 = vld [vmem:[%s1517_s9 + $0x1e8] sm:$0xff]  ;;  %v293_v15 = vld [vmem:[%s1517_s9 + $0x2e0] sm:$0xff] }
  0xdb   : > { %1021 = vst [vmem:[%s1636_s26 + $0x230] sm:$0xff] %v807_v12  ;;  %v230_v12 = vld [vmem:[%s1517_s9 + $0xe8] sm:$0xff] }
  0xdc   : > { %1053 = vst [vmem:[%s1636_s26 + $0x330] sm:$0xff] %v887_v13  ;;  %v261_v13 = vld [vmem:[%s1517_s9 + $0x1e0] sm:$0xff]  ;;  %v343_v21 = vpack.c.bf16 %v230_v12, %v229_v11 }
  0xdd   : > { %958 = vst [vmem:[%s1636_s26 + $0x38] sm:$0xff] %v649_v16  ;;  %v294_v16 = vld [vmem:[%s1517_s9 + $0x2e8] sm:$0xff]  ;;  %v359_v22 = vpack.c.bf16 %v262_v14, %v261_v13 }
  0xde   : > { %990 = vst [vmem:[%s1636_s26 + $0x138] sm:$0xff] %v729_v17  ;;  %v325_v17 = vld [vmem:[%s1517_s9 + $0x3e0] sm:$0xff] }
  0xe0   : > { %v808_v26 = vpop.f32.mrf.mxu2  ;;  %v888_v27 = vpop.f32.mrf.mxu3 }
  0xe1   : > { %v809_v30 = vadd.f32 %v1622_v36, %v808_v26  ;;  %v889_v31 = vadd.f32 %v1622_v36, %v888_v27  ;;  %v651_v32 = vpop.f32.mrf.mxu0  ;;  %v731_v33 = vpop.f32.mrf.mxu1  ;;  %v375_v27 = vpack.c.bf16 %v294_v16, %v293_v15 }
  0xe2   : > { %v652_v37 = vadd.f32 %v1622_v36, %v651_v32  ;;  %v732_v38 = vadd.f32 %v1622_v36, %v731_v33 }
  0xe3   : > { %1022 = vst [vmem:[%s1636_s26 + $0x238] sm:$0xff] %v809_v30 }
  0xe4   : > { %1054 = vst [vmem:[%s1636_s26 + $0x338] sm:$0xff] %v889_v31  ;;  %1212 = vmatmul.msk.bf16.gmra.mxu0 %vm429_vm0, %v341_v28  ;;  %1228 = vmatmul.msk.bf16.gmra.mxu1 %vm429_vm0, %v357_v29  ;;  %v391_v28 = vpack.c.bf16 %v326_v18, %v325_v17 }
  0xe5   : > { %959 = vst [vmem:[%s1636_s26 + $0x40] sm:$0xff] %v652_v37  ;;  %1244 = vmatmul.msk.bf16.gmra.mxu2 %vm429_vm0, %v373_v34  ;;  %1260 = vmatmul.msk.bf16.gmra.mxu3 %vm429_vm0, %v389_v35 }
  0xe6   : > { %991 = vst [vmem:[%s1636_s26 + $0x140] sm:$0xff] %v732_v38 }
  0xe8   : > { %v811_v39 = vpop.f32.mrf.mxu2  ;;  %v891_v40 = vpop.f32.mrf.mxu3 }
  0xe9   : > { %v812_v41 = vadd.f32 %v1622_v36, %v811_v39  ;;  %v892_v42 = vadd.f32 %v1622_v36, %v891_v40  ;;  %v653_v43 = vpop.f32.mrf.mxu0  ;;  %v733_v44 = vpop.f32.mrf.mxu1  ;;  %v231_v40 = vld [vmem:[%s1517_s9 + $0xf0] sm:$0xff] }
  0xea   : > { %v654_v45 = vadd.f32 %v1622_v36, %v653_v43  ;;  %v734_v46 = vadd.f32 %v1622_v36, %v733_v44  ;;  %v264_v43 = vld [vmem:[%s1517_s9 + $0x1f8] sm:$0xff]  ;;  %v295_v44 = vld [vmem:[%s1517_s9 + $0x2f0] sm:$0xff] }
  0xeb   : > { %1023 = vst [vmem:[%s1636_s26 + $0x240] sm:$0xff] %v812_v41  ;;  %v232_v41 = vld [vmem:[%s1517_s9 + $0xf8] sm:$0xff] }
  0xec   : > { %1055 = vst [vmem:[%s1636_s26 + $0x340] sm:$0xff] %v892_v42  ;;  %v263_v42 = vld [vmem:[%s1517_s9 + $0x1f0] sm:$0xff]  ;;  %v344_v50 = vpack.c.bf16 %v232_v41, %v231_v40 }
  0xed   : > { %960 = vst [vmem:[%s1636_s26 + $0x48] sm:$0xff] %v654_v45  ;;  %v296_v45 = vld [vmem:[%s1517_s9 + $0x2f8] sm:$0xff]  ;;  %v360_v51 = vpack.c.bf16 %v264_v43, %v263_v42 }
  0xee   : > { %992 = vst [vmem:[%s1636_s26 + $0x148] sm:$0xff] %v734_v46  ;;  %v327_v46 = vld [vmem:[%s1517_s9 + $0x3f0] sm:$0xff]  ;;  %s1362_s9 = scalar_lea.hbm %s1361_s8, 1024 }
  0xef   : > { %p1363_p12 = scmp.ne.s32.totalorder %s1361_s8, %s1362_s9  ;;  %p1368_p2 = scmp.lt.s32.totalorder %s1366_s19, %s1362_s9 }
  0xf0   : > { %v813_v55 = vpop.f32.mrf.mxu2  ;;  %v893_v56 = vpop.f32.mrf.mxu3 }
  0xf1   : > { %v814_v59 = vadd.f32 %v1622_v36, %v813_v55  ;;  %v894_v60 = vadd.f32 %v1622_v36, %v893_v56  ;;  %v656_v61 = vpop.f32.mrf.mxu0  ;;  %v736_v62 = vpop.f32.mrf.mxu1  ;;  %v376_v56 = vpack.c.bf16 %v296_v45, %v295_v44  ;;  %p1364_p13 = pnand %p1363_p12, %p1488_p4  ;;  %p1369_p3 = por %p1368_p2, %p1367_p1 }
  0xf2   : > { %v657_v1 = vadd.f32 %v1622_v36, %v656_v61  ;;  %v737_v2 = vadd.f32 %v1622_v36, %v736_v62 }
  0xf3   : > { %1024 = vst [vmem:[%s1636_s26 + $0x248] sm:$0xff] %v814_v59  ;;  %p1365_p0 = pneg %p1364_p13 }
  0xf4   : > { %1056 = vst [vmem:[%s1636_s26 + $0x348] sm:$0xff] %v894_v60  ;;  %1213 = vmatmul.msk.bf16.gmra.mxu0 %vm429_vm0, %v342_v57  ;;  %1229 = vmatmul.msk.bf16.gmra.mxu1 %vm429_vm0, %v358_v58  ;;  %v392_v57 = vpack.c.bf16 %v328_v47, %v327_v46 }
  0xf5   : > { %961 = vst [vmem:[%s1636_s26 + $0x50] sm:$0xff] %v657_v1  ;;  %1245 = vmatmul.msk.bf16.gmra.mxu2 %vm429_vm0, %v374_v63  ;;  %1261 = vmatmul.msk.bf16.gmra.mxu3 %vm429_vm0, %v390_v0  ;;  %p1370_p5 = pnand %p1369_p3, %p1365_p0 }
  0xf6   : > { %993 = vst [vmem:[%s1636_s26 + $0x150] sm:$0xff] %v737_v2 }
  0xf8   : > { %v816_v3 = vpop.f32.mrf.mxu2  ;;  %v896_v4 = vpop.f32.mrf.mxu3 }
  0xf9   : > { %v817_v5 = vadd.f32 %v1622_v36, %v816_v3  ;;  %v897_v6 = vadd.f32 %v1622_v36, %v896_v4  ;;  %v658_v7 = vpop.f32.mrf.mxu0  ;;  %v738_v8 = vpop.f32.mrf.mxu1 }
  0xfa   : > { %v659_v9 = vadd.f32 %v1622_v36, %v658_v7  ;;  %v739_v10 = vadd.f32 %v1622_v36, %v738_v8 }
  0xfb   : > { %1025 = vst [vmem:[%s1636_s26 + $0x250] sm:$0xff] %v817_v5 }
  0xfc   : > { %1057 = vst [vmem:[%s1636_s26 + $0x350] sm:$0xff] %v897_v6 }
  0xfd   : > { %962 = vst [vmem:[%s1636_s26 + $0x58] sm:$0xff] %v659_v9 }
  0xfe   : > { %994 = vst [vmem:[%s1636_s26 + $0x158] sm:$0xff] %v739_v10 }
 0x100   : > { %v818_v19 = vpop.f32.mrf.mxu2  ;;  %v898_v20 = vpop.f32.mrf.mxu3 }
 0x101   : > { %v819_v23 = vadd.f32 %v1622_v36, %v818_v19  ;;  %v899_v24 = vadd.f32 %v1622_v36, %v898_v20  ;;  %v661_v25 = vpop.f32.mrf.mxu0  ;;  %v741_v26 = vpop.f32.mrf.mxu1 }
 0x102   : > { %v662_v29 = vadd.f32 %v1622_v36, %v661_v25  ;;  %v742_v30 = vadd.f32 %v1622_v36, %v741_v26 }
 0x103   : > { %1026 = vst [vmem:[%s1636_s26 + $0x258] sm:$0xff] %v819_v23 }
 0x104   : > { %1058 = vst [vmem:[%s1636_s26 + $0x358] sm:$0xff] %v899_v24  ;;  %1214 = vmatmul.msk.bf16.gmra.mxu0 %vm429_vm0, %v343_v21  ;;  %1230 = vmatmul.msk.bf16.gmra.mxu1 %vm429_vm0, %v359_v22 }
 0x105   : > { %963 = vst [vmem:[%s1636_s26 + $0x60] sm:$0xff] %v662_v29  ;;  %1246 = vmatmul.msk.bf16.gmra.mxu2 %vm429_vm0, %v375_v27  ;;  %1262 = vmatmul.msk.bf16.gmra.mxu3 %vm429_vm0, %v391_v28 }
 0x106   : > { %995 = vst [vmem:[%s1636_s26 + $0x160] sm:$0xff] %v742_v30 }
 0x108   : > { %v821_v31 = vpop.f32.mrf.mxu2  ;;  %v901_v32 = vpop.f32.mrf.mxu3 }
 0x109   : > { %v822_v33 = vadd.f32 %v1622_v36, %v821_v31  ;;  %v902_v34 = vadd.f32 %v1622_v36, %v901_v32  ;;  %v663_v35 = vpop.f32.mrf.mxu0  ;;  %v743_v37 = vpop.f32.mrf.mxu1 }
 0x10a   : > { %v664_v38 = vadd.f32 %v1622_v36, %v663_v35  ;;  %v744_v39 = vadd.f32 %v1622_v36, %v743_v37 }
 0x10b   : > { %1027 = vst [vmem:[%s1636_s26 + $0x260] sm:$0xff] %v822_v33 }
 0x10c   : > { %1059 = vst [vmem:[%s1636_s26 + $0x360] sm:$0xff] %v902_v34 }
 0x10d   : > { %964 = vst [vmem:[%s1636_s26 + $0x68] sm:$0xff] %v664_v38 }
 0x10e   : > { %996 = vst [vmem:[%s1636_s26 + $0x168] sm:$0xff] %v744_v39 }
 0x110   : > { %v823_v48 = vpop.f32.mrf.mxu2  ;;  %v903_v49 = vpop.f32.mrf.mxu3 }
 0x111   : > { %v824_v52 = vadd.f32 %v1622_v36, %v823_v48  ;;  %v904_v53 = vadd.f32 %v1622_v36, %v903_v49  ;;  %v666_v54 = vpop.f32.mrf.mxu0  ;;  %v746_v55 = vpop.f32.mrf.mxu1 }
 0x112   : > { %v667_v58 = vadd.f32 %v1622_v36, %v666_v54  ;;  %v747_v59 = vadd.f32 %v1622_v36, %v746_v55 }
 0x113   : > { %1028 = vst [vmem:[%s1636_s26 + $0x268] sm:$0xff] %v824_v52 }
 0x114   : > { %1060 = vst [vmem:[%s1636_s26 + $0x368] sm:$0xff] %v904_v53  ;;  %1215 = vmatmul.msk.bf16.gmra.mxu0 %vm429_vm0, %v344_v50  ;;  %1231 = vmatmul.msk.bf16.gmra.mxu1 %vm429_vm0, %v360_v51 }
 0x115   : > { %965 = vst [vmem:[%s1636_s26 + $0x70] sm:$0xff] %v667_v58  ;;  %1247 = vmatmul.msk.bf16.gmra.mxu2 %vm429_vm0, %v376_v56  ;;  %1263 = vmatmul.msk.bf16.gmra.mxu3 %vm429_vm0, %v392_v57 }
 0x116   : > { %997 = vst [vmem:[%s1636_s26 + $0x170] sm:$0xff] %v747_v59 }
 0x118   : > { %v826_v60 = vpop.f32.mrf.mxu2  ;;  %v906_v61 = vpop.f32.mrf.mxu3 }
 0x119   : > { %v827_v62 = vadd.f32 %v1622_v36, %v826_v60  ;;  %v907_v63 = vadd.f32 %v1622_v36, %v906_v61  ;;  %v668_v0 = vpop.f32.mrf.mxu0  ;;  %v748_v1 = vpop.f32.mrf.mxu1 }
 0x11a   : > { %v669_v2 = vadd.f32 %v1622_v36, %v668_v0  ;;  %v749_v3 = vadd.f32 %v1622_v36, %v748_v1 }
 0x11b   : > { %1029 = vst [vmem:[%s1636_s26 + $0x270] sm:$0xff] %v827_v62 }
 0x11c   : > { %1061 = vst [vmem:[%s1636_s26 + $0x370] sm:$0xff] %v907_v63 }
 0x11d   : > { %966 = vst [vmem:[%s1636_s26 + $0x78] sm:$0xff] %v669_v2 }
 0x11e   : > { %998 = vst [vmem:[%s1636_s26 + $0x178] sm:$0xff] %v749_v3 }
 0x120   : > { %v828_v4 = vpop.f32.mrf.mxu2  ;;  %v908_v5 = vpop.f32.mrf.mxu3 }
 0x121   : > { %v829_v6 = vadd.f32 %v1622_v36, %v828_v4  ;;  %v909_v7 = vadd.f32 %v1622_v36, %v908_v5  ;;  %v671_v8 = vpop.f32.mrf.mxu0  ;;  %v751_v9 = vpop.f32.mrf.mxu1 }
 0x122   : > { %v672_v10 = vadd.f32 %v1622_v36, %v671_v8  ;;  %v752_v11 = vadd.f32 %v1622_v36, %v751_v9 }
 0x123   : > { %1030 = vst [vmem:[%s1636_s26 + $0x278] sm:$0xff] %v829_v6 }
 0x124   : > { %1062 = vst [vmem:[%s1636_s26 + $0x378] sm:$0xff] %v909_v7 }
 0x125   : > { %967 = vst [vmem:[%s1636_s26 + $0x80] sm:$0xff] %v672_v10 }
 0x126   : > { %999 = vst [vmem:[%s1636_s26 + $0x180] sm:$0xff] %v752_v11 }
 0x128   : > { %v831_v12 = vpop.f32.mrf.mxu2  ;;  %v911_v13 = vpop.f32.mrf.mxu3 }
 0x129   : > { %v832_v14 = vadd.f32 %v1622_v36, %v831_v12  ;;  %v912_v15 = vadd.f32 %v1622_v36, %v911_v13  ;;  %v673_v16 = vpop.f32.mrf.mxu0  ;;  %v753_v17 = vpop.f32.mrf.mxu1 }
 0x12a   : > { %v674_v18 = vadd.f32 %v1622_v36, %v673_v16  ;;  %v754_v19 = vadd.f32 %v1622_v36, %v753_v17 }
 0x12b   : > { %1031 = vst [vmem:[%s1636_s26 + $0x280] sm:$0xff] %v832_v14 }
 0x12c   : > { %1063 = vst [vmem:[%s1636_s26 + $0x380] sm:$0xff] %v912_v15 }
 0x12d   : > { %968 = vst [vmem:[%s1636_s26 + $0x88] sm:$0xff] %v674_v18 }
 0x12e   : > { %1000 = vst [vmem:[%s1636_s26 + $0x188] sm:$0xff] %v754_v19 }
 0x130   : > { %v833_v20 = vpop.f32.mrf.mxu2  ;;  %v913_v21 = vpop.f32.mrf.mxu3 }
 0x131   : > { %v834_v22 = vadd.f32 %v1622_v36, %v833_v20  ;;  %v914_v23 = vadd.f32 %v1622_v36, %v913_v21  ;;  %v676_v24 = vpop.f32.mrf.mxu0  ;;  %v756_v25 = vpop.f32.mrf.mxu1 }
 0x132   : > { %v677_v26 = vadd.f32 %v1622_v36, %v676_v24  ;;  %v757_v27 = vadd.f32 %v1622_v36, %v756_v25 }
 0x133   : > { %1032 = vst [vmem:[%s1636_s26 + $0x288] sm:$0xff] %v834_v22 }
 0x134   : > { %1064 = vst [vmem:[%s1636_s26 + $0x388] sm:$0xff] %v914_v23 }
 0x135   : > { %969 = vst [vmem:[%s1636_s26 + $0x90] sm:$0xff] %v677_v26 }
 0x136   : > { %1001 = vst [vmem:[%s1636_s26 + $0x190] sm:$0xff] %v757_v27 }
 0x138   : > { %v836_v28 = vpop.f32.mrf.mxu2  ;;  %v916_v29 = vpop.f32.mrf.mxu3 }
 0x139   : > { %v837_v30 = vadd.f32 %v1622_v36, %v836_v28  ;;  %v917_v31 = vadd.f32 %v1622_v36, %v916_v29  ;;  %v678_v32 = vpop.f32.mrf.mxu0  ;;  %v758_v33 = vpop.f32.mrf.mxu1 }
 0x13a   : > { %v679_v34 = vadd.f32 %v1622_v36, %v678_v32  ;;  %v759_v35 = vadd.f32 %v1622_v36, %v758_v33 }
 0x13b   : > { %1033 = vst [vmem:[%s1636_s26 + $0x290] sm:$0xff] %v837_v30 }
 0x13c   : > { %1065 = vst [vmem:[%s1636_s26 + $0x390] sm:$0xff] %v917_v31 }
 0x13d   : > { %970 = vst [vmem:[%s1636_s26 + $0x98] sm:$0xff] %v679_v34 }
 0x13e   : > { %1002 = vst [vmem:[%s1636_s26 + $0x198] sm:$0xff] %v759_v35 }
 0x140   : > { %v838_v37 = vpop.f32.mrf.mxu2  ;;  %v918_v38 = vpop.f32.mrf.mxu3 }
 0x141   : > { %v839_v39 = vadd.f32 %v1622_v36, %v838_v37  ;;  %v919_v40 = vadd.f32 %v1622_v36, %v918_v38  ;;  %v681_v41 = vpop.f32.mrf.mxu0  ;;  %v761_v42 = vpop.f32.mrf.mxu1 }
 0x142   : > { %v682_v43 = vadd.f32 %v1622_v36, %v681_v41  ;;  %v762_v44 = vadd.f32 %v1622_v36, %v761_v42 }
 0x143   : > { %1034 = vst [vmem:[%s1636_s26 + $0x298] sm:$0xff] %v839_v39 }
 0x144   : > { %1066 = vst [vmem:[%s1636_s26 + $0x398] sm:$0xff] %v919_v40 }
 0x145   : > { %971 = vst [vmem:[%s1636_s26 + $0xa0] sm:$0xff] %v682_v43 }
 0x146   : > { %1003 = vst [vmem:[%s1636_s26 + $0x1a0] sm:$0xff] %v762_v44 }
 0x148   : > { %v841_v45 = vpop.f32.mrf.mxu2  ;;  %v921_v46 = vpop.f32.mrf.mxu3 }
 0x149   : > { %v842_v47 = vadd.f32 %v1622_v36, %v841_v45  ;;  %v922_v48 = vadd.f32 %v1622_v36, %v921_v46  ;;  %v683_v49 = vpop.f32.mrf.mxu0  ;;  %v763_v50 = vpop.f32.mrf.mxu1 }
 0x14a   : > { %v684_v51 = vadd.f32 %v1622_v36, %v683_v49  ;;  %v764_v52 = vadd.f32 %v1622_v36, %v763_v50 }
 0x14b   : > { %1035 = vst [vmem:[%s1636_s26 + $0x2a0] sm:$0xff] %v842_v47 }
 0x14c   : > { %1067 = vst [vmem:[%s1636_s26 + $0x3a0] sm:$0xff] %v922_v48 }
 0x14d   : > { %972 = vst [vmem:[%s1636_s26 + $0xa8] sm:$0xff] %v684_v51 }
 0x14e   : > { %1004 = vst [vmem:[%s1636_s26 + $0x1a8] sm:$0xff] %v764_v52 }
 0x150   : > { %v843_v53 = vpop.f32.mrf.mxu2  ;;  %v923_v54 = vpop.f32.mrf.mxu3 }
 0x151   : > { %v844_v55 = vadd.f32 %v1622_v36, %v843_v53  ;;  %v924_v56 = vadd.f32 %v1622_v36, %v923_v54  ;;  %v686_v57 = vpop.f32.mrf.mxu0  ;;  %v766_v58 = vpop.f32.mrf.mxu1 }
 0x152   : > { %v687_v59 = vadd.f32 %v1622_v36, %v686_v57  ;;  %v767_v60 = vadd.f32 %v1622_v36, %v766_v58 }
 0x153   : > { %1036 = vst [vmem:[%s1636_s26 + $0x2a8] sm:$0xff] %v844_v55 }
 0x154   : > { %1068 = vst [vmem:[%s1636_s26 + $0x3a8] sm:$0xff] %v924_v56 }
 0x155   : > { %973 = vst [vmem:[%s1636_s26 + $0xb0] sm:$0xff] %v687_v59 }
 0x156   : > { %1005 = vst [vmem:[%s1636_s26 + $0x1b0] sm:$0xff] %v767_v60 }
 0x158   : > { %v846_v61 = vpop.f32.mrf.mxu2  ;;  %v926_v62 = vpop.f32.mrf.mxu3 }
 0x159   : > { %v847_v63 = vadd.f32 %v1622_v36, %v846_v61  ;;  %v927_v0 = vadd.f32 %v1622_v36, %v926_v62  ;;  %v688_v1 = vpop.f32.mrf.mxu0  ;;  %v768_v2 = vpop.f32.mrf.mxu1 }
 0x15a   : > { %v689_v3 = vadd.f32 %v1622_v36, %v688_v1  ;;  %v769_v4 = vadd.f32 %v1622_v36, %v768_v2 }
 0x15b   : > { %1037 = vst [vmem:[%s1636_s26 + $0x2b0] sm:$0xff] %v847_v63 }
 0x15c   : > { %1069 = vst [vmem:[%s1636_s26 + $0x3b0] sm:$0xff] %v927_v0 }
 0x15d   : > { %974 = vst [vmem:[%s1636_s26 + $0xb8] sm:$0xff] %v689_v3 }
 0x15e   : > { %1006 = vst [vmem:[%s1636_s26 + $0x1b8] sm:$0xff] %v769_v4 }
 0x160   : > { %v848_v5 = vpop.f32.mrf.mxu2  ;;  %v928_v6 = vpop.f32.mrf.mxu3 }
 0x161   : > { %v849_v7 = vadd.f32 %v1622_v36, %v848_v5  ;;  %v929_v8 = vadd.f32 %v1622_v36, %v928_v6  ;;  %v691_v9 = vpop.f32.mrf.mxu0  ;;  %v771_v10 = vpop.f32.mrf.mxu1 }
 0x162   : > { %v692_v11 = vadd.f32 %v1622_v36, %v691_v9  ;;  %v772_v12 = vadd.f32 %v1622_v36, %v771_v10 }
 0x163   : > { %1038 = vst [vmem:[%s1636_s26 + $0x2b8] sm:$0xff] %v849_v7 }
 0x164   : > { %1070 = vst [vmem:[%s1636_s26 + $0x3b8] sm:$0xff] %v929_v8  ;;  %v1345_v8 = vld [vmem:[%s2022_s2] ss:$0 sm:$0xff] }
 0x165   : > { %975 = vst [vmem:[%s1636_s26 + $0xc0] sm:$0xff] %v692_v11 }
 0x166   : > { %1007 = vst [vmem:[%s1636_s26 + $0x1c0] sm:$0xff] %v772_v12 }
 0x168   : > { %v851_v13 = vpop.f32.mrf.mxu2  ;;  %v931_v14 = vpop.f32.mrf.mxu3 }
 0x169   : > { %v852_v15 = vadd.f32 %v1622_v36, %v851_v13  ;;  %v932_v16 = vadd.f32 %v1622_v36, %v931_v14  ;;  %v693_v17 = vpop.f32.mrf.mxu0  ;;  %v773_v18 = vpop.f32.mrf.mxu1 }
 0x16a   : > { %v694_v19 = vadd.f32 %v1622_v36, %v693_v17  ;;  %v774_v20 = vadd.f32 %v1622_v36, %v773_v18 }
 0x16b   : > { %1039 = vst [vmem:[%s1636_s26 + $0x2c0] sm:$0xff] %v852_v15 }
 0x16c   : > { %1071 = vst [vmem:[%s1636_s26 + $0x3c0] sm:$0xff] %v932_v16 }
 0x16d   : > { %976 = vst [vmem:[%s1636_s26 + $0xc8] sm:$0xff] %v694_v19 }
 0x16e   : > { %1008 = vst [vmem:[%s1636_s26 + $0x1c8] sm:$0xff] %v774_v20 }
 0x170   : > { %v853_v21 = vpop.f32.mrf.mxu2  ;;  %v933_v22 = vpop.f32.mrf.mxu3 }
 0x171   : > { %v854_v23 = vadd.f32 %v1622_v36, %v853_v21  ;;  %v934_v24 = vadd.f32 %v1622_v36, %v933_v22  ;;  %v696_v25 = vpop.f32.mrf.mxu0  ;;  %v776_v26 = vpop.f32.mrf.mxu1 }
 0x172   : > { %v697_v27 = vadd.f32 %v1622_v36, %v696_v25  ;;  %v777_v28 = vadd.f32 %v1622_v36, %v776_v26 }
 0x173   : > { %1040 = vst [vmem:[%s1636_s26 + $0x2c8] sm:$0xff] %v854_v23 }
 0x174   : > { %1072 = vst [vmem:[%s1636_s26 + $0x3c8] sm:$0xff] %v934_v24 }
 0x175   : > { %977 = vst [vmem:[%s1636_s26 + $0xd0] sm:$0xff] %v697_v27 }
 0x176   : > { %1009 = vst [vmem:[%s1636_s26 + $0x1d0] sm:$0xff] %v777_v28 }
 0x178   : > { %v856_v29 = vpop.f32.mrf.mxu2  ;;  %v936_v30 = vpop.f32.mrf.mxu3 }
 0x179   : > { %v857_v31 = vadd.f32 %v1622_v36, %v856_v29  ;;  %v937_v32 = vadd.f32 %v1622_v36, %v936_v30  ;;  %v698_v33 = vpop.f32.mrf.mxu0  ;;  %v778_v34 = vpop.f32.mrf.mxu1 }
 0x17a   : > { %v699_v35 = vadd.f32 %v1622_v36, %v698_v33  ;;  %v779_v37 = vadd.f32 %v1622_v36, %v778_v34 }
 0x17b   : > { %1041 = vst [vmem:[%s1636_s26 + $0x2d0] sm:$0xff] %v857_v31 }
 0x17c   : > { %1073 = vst [vmem:[%s1636_s26 + $0x3d0] sm:$0xff] %v937_v32 }
 0x17d   : > { %978 = vst [vmem:[%s1636_s26 + $0xd8] sm:$0xff] %v699_v35 }
 0x17e   : > { %1010 = vst [vmem:[%s1636_s26 + $0x1d8] sm:$0xff] %v779_v37 }
 0x180   : > { %v858_v38 = vpop.f32.mrf.mxu2  ;;  %v938_v39 = vpop.f32.mrf.mxu3 }
 0x181   : > { %v859_v40 = vadd.f32 %v1622_v36, %v858_v38  ;;  %v939_v41 = vadd.f32 %v1622_v36, %v938_v39  ;;  %v701_v42 = vpop.f32.mrf.mxu0  ;;  %v781_v43 = vpop.f32.mrf.mxu1 }
 0x182   : > { %v702_v44 = vadd.f32 %v1622_v36, %v701_v42  ;;  %v782_v45 = vadd.f32 %v1622_v36, %v781_v43 }
 0x183   : > { %1042 = vst [vmem:[%s1636_s26 + $0x2d8] sm:$0xff] %v859_v40 }
 0x184   : > { %1074 = vst [vmem:[%s1636_s26 + $0x3d8] sm:$0xff] %v939_v41 }
 0x185   : > { %979 = vst [vmem:[%s1636_s26 + $0xe0] sm:$0xff] %v702_v44 }
 0x186   : > { %1011 = vst [vmem:[%s1636_s26 + $0x1e0] sm:$0xff] %v782_v45 }
 0x188   : > { %v861_v46 = vpop.f32.mrf.mxu2  ;;  %v941_v47 = vpop.f32.mrf.mxu3 }
 0x189   : > { %v862_v48 = vadd.f32 %v1622_v36, %v861_v46  ;;  %v942_v49 = vadd.f32 %v1622_v36, %v941_v47  ;;  %v703_v50 = vpop.f32.mrf.mxu0  ;;  %v783_v51 = vpop.f32.mrf.mxu1 }
 0x18a   : > { %v704_v52 = vadd.f32 %v1622_v36, %v703_v50  ;;  %v784_v53 = vadd.f32 %v1622_v36, %v783_v51 }
 0x18b   : > { %1043 = vst [vmem:[%s1636_s26 + $0x2e0] sm:$0xff] %v862_v48 }
 0x18c   : > { %1075 = vst [vmem:[%s1636_s26 + $0x3e0] sm:$0xff] %v942_v49 }
 0x18d   : > { %980 = vst [vmem:[%s1636_s26 + $0xe8] sm:$0xff] %v704_v52 }
 0x18e   : > { %1012 = vst [vmem:[%s1636_s26 + $0x1e8] sm:$0xff] %v784_v53 }
 0x190   : > { %v863_v54 = vpop.f32.mrf.mxu2  ;;  %v943_v55 = vpop.f32.mrf.mxu3 }
 0x191   : > { %v864_v56 = vadd.f32 %v1622_v36, %v863_v54  ;;  %v944_v57 = vadd.f32 %v1622_v36, %v943_v55  ;;  %v706_v58 = vpop.f32.mrf.mxu0  ;;  %v786_v59 = vpop.f32.mrf.mxu1 }
 0x192   : > { %v707_v60 = vadd.f32 %v1622_v36, %v706_v58  ;;  %v787_v61 = vadd.f32 %v1622_v36, %v786_v59 }
 0x193   : > { %1044 = vst [vmem:[%s1636_s26 + $0x2e8] sm:$0xff] %v864_v56 }
 0x194   : > { %1076 = vst [vmem:[%s1636_s26 + $0x3e8] sm:$0xff] %v944_v57 }
 0x195   : > { %981 = vst [vmem:[%s1636_s26 + $0xf0] sm:$0xff] %v707_v60 }
 0x196   : > { %1013 = vst [vmem:[%s1636_s26 + $0x1f0] sm:$0xff] %v787_v61 }
 0x198   : > { %v866_v62 = vpop.f32.mrf.mxu2  ;;  %v946_v63 = vpop.f32.mrf.mxu3 }
 0x199   : > { %v867_v0 = vadd.f32 %v1622_v36, %v866_v62  ;;  %v947_v1 = vadd.f32 %v1622_v36, %v946_v63  ;;  %v708_v2 = vpop.f32.mrf.mxu0  ;;  %v788_v3 = vpop.f32.mrf.mxu1 }
 0x19a   : > { %v709_v4 = vadd.f32 %v1622_v36, %v708_v2  ;;  %v789_v5 = vadd.f32 %v1622_v36, %v788_v3 }
 0x19b   : > { %1045 = vst [vmem:[%s1636_s26 + $0x2f0] sm:$0xff] %v867_v0 }
 0x19c   : > { %1077 = vst [vmem:[%s1636_s26 + $0x3f0] sm:$0xff] %v947_v1 }
 0x19d   : > { %982 = vst [vmem:[%s1636_s26 + $0xf8] sm:$0xff] %v709_v4 }
 0x19e   : > { %1014 = vst [vmem:[%s1636_s26 + $0x1f8] sm:$0xff] %v789_v5 }
 0x1a0   : > { %v868_v6 = vpop.f32.mrf.mxu2  ;;  %v948_v7 = vpop.f32.mrf.mxu3 }
 0x1a1   : > { %v869_v36 = vadd.f32 %v1345_v8, %v868_v6  ;;  %v949_v9 = vadd.f32 %v1345_v8, %v948_v7 }
 0x1a3   : > { %1046 = vst [vmem:[%s1636_s26 + $0x2f8] sm:$0xff] %v869_v36 }
 0x1a4   : > { %1078 = vst [vmem:[%s1636_s26 + $0x3f8] sm:$0xff] %v949_v9 }
 0x1a5   : > { %1373 = shalt.err (!%p1370_p5)
}
 0x1a6   : > { %s1426_s18 = smov 128   ;;  %s1427_s26 = smov 8  }
 0x1a7   : > { %1287 = dma.vmem_to_hbm [thread:$0]  (%p1488_p4), %s1095_s15, 16384, %s1097_s4, %s1080_s7, %s1426_s18, %s1426_s18, %s1427_s26  }
 0x1a8 PF: > { %p1293_p6 = scmp.ge.s32.totalorder %s1424_s17, 2  ;;  %s1111_s27 = sand.u32 1, %s1404_s12  }
 0x1a9   : > { %s1112_s28 = scalar_lea.sflag [#allocation3], %s1111_s27 }
 0x1aa   : > { %p1290_p7 = pnand %p1293_p6, %p1495_p8 }
 0x1ac   : > { %p1291_p9 = pneg %p1290_p7 }
 0x1ae   : > { %1399 = dma.done.wait (%p1291_p9), %s1112_s28, 16384  }
 0x1af   : > { %1401 = vsyncadd (%p1291_p9), %s1112_s28, 4294950912  ;;  %s16_s17 = sadd.s32 1, %s1424_s17   ;;  %s2026_s12 = smov %s1408_s13 }
 0x1b0   : > { %p13_p10 = scmp.ge.s32.totalorder %s16_s17, 4   ;;  %s2027_s13 = smov %s1412_s14 }
 0x1b1   : > { %s2028_s14 = smov %s1501_s25  ;;  %s2029_s15 = smov %s1420_s16 }
 0x1b2   : > { %s2030_s16 = smov %s2032_s20  ;;  %15 = sbr.rel (!%p13_p10) target bundleno = 4 (0x4), region = 67 }
 0x1b7   :  { %1118 = vsyncpa [#allocation3], 1 }
 0x1b8   :  { %1120 = vsyncpa [#allocation3 + $0x1], 1 }

</bundles_post_ra>
